<compile_context>
chip_gen: v6e
topology: v6e:2x2x1
jax: 0.10.0
libtpu: 0.0.40
codegen_flags: <defaults>
</compile_context>

<pallas_src>
import functools

import numpy as np
import jax
import jax.numpy as jnp
from jax import lax
from jax.experimental import pallas as pl
from jax.experimental.pallas import tpu as pltpu


_X_BUDGET_CAP = 40 * 1024 * 1024          # hard cap per x VMEM buffer
_SINGLE_BUFFER_MIN_BYTES = 1 * 1024 * 1024  # single-buffer constants above this


# --------------------------------------------------------------------------- #
# Kernel
# --------------------------------------------------------------------------- #
def _chrom_kernel(x_ref, w_ref, m_ref, o_ref, acc_ref, *, t, hw_total, mask_tail):
    # x_ref  : (bt, hw_tile, 3T)  interleaved RGB*time on the lane axis
    # w_ref  : (3T, 3T)   fused [de-interleave + chrom projection + RGB sum + 1/HW]
    # m_ref  : (T, Tp)    band-pass operator (columns zero-padded to Tp)
    # o_ref  : (bt, Tp)   lane-dense output block
    # acc_ref: (bt, 1, 3T) f32 spatial-sum accumulator (keepdims layout)
    hw_step = pl.program_id(1)

    @pl.when(hw_step == 0)
    def _init():
        acc_ref[...] = jnp.zeros_like(acc_ref)

    # Partial spatial sum for this pixel tile; accumulate in f32 regardless of
    # the storage dtype of x.
    xb = x_ref[...].astype(jnp.float32)                   # (bt, hw_tile, 3T)
    if mask_tail:
        # cdiv grid: zero out the rows of the last HW tile that fall past HW.
        hw_tile = x_ref.shape[1]
        row = lax.broadcasted_iota(jnp.int32, (1, hw_tile, 1), 1)
        xb = jnp.where(hw_step * hw_tile + row < hw_total, xb, 0.0)
    acc_ref[...] += jnp.sum(xb, axis=1, keepdims=True)    # (bt, 1, 3T)

    @pl.when(hw_step == pl.num_programs(1) - 1)
    def _finalize():
        acc = acc_ref[...][:, 0, :]                        # (bt, 3T)

        # One small MXU matmul on the reduced data: de-interleaves RGB, applies
        # the chrominance projections, the per-frame channel sum, and 1/HW.
        proj = jnp.dot(acc, w_ref[...],
                       preferred_element_type=jnp.float32,
                       precision=lax.Precision.HIGHEST)    # (bt, 3T)
        x_num = proj[:, 0:t]                               # mean(3R - 2G)
        y_num = proj[:, t:2 * t]                           # mean(1.5R + G - 1.5B)
        sum_rgb = proj[:, 2 * t:3 * t]                     # mean(R + G + B)

        den = sum_rgb + 1e-8                               # exact division (epilogue
        x_c = x_num / den                                  # runs once per batch block
        y_c = y_num / den                                  # -> exactness is free)

        def _std_unbiased(v):                              # torch.std default ddof=1
            mu = jnp.sum(v, axis=1, keepdims=True) * (1.0 / t)
            d = v - mu
            return jnp.sqrt(jnp.sum(d * d, axis=1, keepdims=True) * (1.0 / (t - 1)))

        alpha = _std_unbiased(x_c) / (_std_unbiased(y_c) + 1e-8)
        s = x_c - alpha * y_c                              # (bt, T)

        # Band-pass = precomputed linear operator irfft(mask * rfft(.)), on MXU,
        # emitting a lane-dense (bt, Tp) output block.
        o_ref[...] = jnp.dot(s, m_ref[...],
                             preferred_element_type=jnp.float32,
                             precision=lax.Precision.HIGHEST).astype(o_ref.dtype)


# --------------------------------------------------------------------------- #
# Host-side helpers
# --------------------------------------------------------------------------- #
def _round_up(n, m):
    return (n + m - 1) // m * m


def _physical_vmem_bytes():
    """Per-generation VMEM capacity (v5e/v6e: 128 MiB, v7x: 64 MiB)."""
    try:
        info = pltpu.get_tpu_info()
        cap = getattr(info, "vmem_capacity_bytes", None)
        if cap:
            return int(cap)
    except Exception:
        pass
    return 64 * 1024 * 1024   # conservative default (v7x per-TensorCore)


def _pick_b_tile(b, hw, px_bytes, budget):
    """Largest batch tile that (a) keeps >= 2 batch blocks (so the 'parallel'
    axis can engage both v7x TensorCores) and (b) fits a full-HW block in the
    per-buffer budget; falls back to 1 (HW gets tiled instead)."""
    if b == 1:
        return 1
    divisors = [d for d in range(1, b // 2 + 1) if b % d == 0]
    fitting = [d for d in divisors if d * hw * px_bytes <= budget]
    return max(fitting) if fitting else 1


def _pick_hw_tile(hw, b_tile, px_bytes, budget, sub):
    """cdiv-friendly HW tile: full HW if it fits, else the largest multiple of
    `sub` (8 for f32, 16 for bf16) under the budget."""
    max_rows = budget // max(1, b_tile * px_bytes)
    if max_rows >= hw:
        return hw
    return max(sub, (max_rows // sub) * sub)


def _spec_with_buffers(block_shape, index_map, buffer_count):
    """BlockSpec with an explicit pipeline depth; falls back to the default
    (double-buffered) spec on jax versions without pipeline_mode."""
    if buffer_count != 2 and hasattr(pl, "Buffered"):
        try:
            return pl.BlockSpec(block_shape, index_map,
                                pipeline_mode=pl.Buffered(buffer_count))
        except TypeError:
            pass
    return pl.BlockSpec(block_shape, index_map)


@functools.lru_cache(maxsize=None)
def _build_operators(t, tp, hw, fs, low, high):
    """Fused projection matrix W (3T, 3T) and band-pass operator M (T, Tp)."""
    inv_hw = 1.0 / hw
    idx = np.arange(t)
    w = np.zeros((3 * t, 3 * t), np.float64)
    # X_ numerator = (3R - 2G)/HW          -> columns [0, T)
    w[3 * idx + 0, idx] = 3.0 * inv_hw
    w[3 * idx + 1, idx] = -2.0 * inv_hw
    # Y_ numerator = (1.5R + G - 1.5B)/HW  -> columns [T, 2T)
    w[3 * idx + 0, t + idx] = 1.5 * inv_hw
    w[3 * idx + 1, t + idx] = 1.0 * inv_hw
    w[3 * idx + 2, t + idx] = -1.5 * inv_hw
    # channel sum (R+G+B)/HW               -> columns [2T, 3T)
    w[3 * idx + 0, 2 * t + idx] = inv_hw
    w[3 * idx + 1, 2 * t + idx] = inv_hw
    w[3 * idx + 2, 2 * t + idx] = inv_hw

    # Band-pass operator: s_bp = s @ M, M[t_in, t_out] = irfft(mask * rfft(e_t_in)).
    # TODO(synk): rfft/irfft have no Pallas primitive; folded into this O(T^2) matrix.
    freq = np.fft.rfftfreq(t, d=1.0 / fs)
    mask = ((freq >= low) & (freq <= high)).astype(np.float64)
    eye = np.eye(t, dtype=np.float64)
    m = np.fft.irfft(np.fft.rfft(eye, axis=1) * mask[None, :], n=t, axis=1)
    mp = np.zeros((t, tp), np.float64)
    mp[:, :t] = m
    return w.astype(np.float32), mp.astype(np.float32)


# --------------------------------------------------------------------------- #
# Public entry point
# --------------------------------------------------------------------------- #
def chrom_forward(x, fs: float = 30.0, low: float = 0.7, high: float = 2.5):
    """x: (B, H, W, T, 3) float -> (B, T) float32"""
    B, H, W, T, C = x.shape
    assert C == 3, "input must have 3 channels"
    assert T >= 2, "need at least 2 frames for the unbiased std"
    HW = H * W
    Tp = _round_up(T, 128)

    w_np, m_np = _build_operators(T, Tp, HW, float(fs), float(low), float(high))
    w_bytes, m_bytes = w_np.nbytes, m_np.nbytes

    # Single-buffer the big, constant operands (their index_map is constant so
    # they are fetched once anyway); keep the default for tiny ones.
    const_bufs = 1 if (max(w_bytes, m_bytes) >= _SINGLE_BUFFER_MIN_BYTES
                       and hasattr(pl, "Buffered")) else 2

    # Per-generation VMEM budgeting: raise the limit on 128 MiB parts, keep
    # ~56 MiB on v7x, and size the (double-buffered) x block from what is left.
    phys = _physical_vmem_bytes()
    vmem_limit = max(32 << 20, min(phys - (8 << 20), 112 << 20))
    reserved = const_bufs * (w_bytes + m_bytes) + (4 << 20)   # consts + acc/out + slack
    x_budget = max(1 << 20, min(_X_BUDGET_CAP, (vmem_limit - reserved) // 2))

    px_bytes = 3 * T * x.dtype.itemsize               # bytes per pixel per batch row
    sub = 16 if x.dtype == jnp.bfloat16 else 8        # sublane packing granularity
    b_tile = _pick_b_tile(B, HW, px_bytes, x_budget)
    hw_tile = _pick_hw_tile(HW, b_tile, px_bytes, x_budget, sub)
    nb = B // b_tile
    grid_hw = pl.cdiv(HW, hw_tile)
    mask_tail = (HW % hw_tile) != 0

    # Deepen the x pipeline only if the extra buffer still fits under the limit.
    x_block_bytes = b_tile * hw_tile * px_bytes
    x_bufs = 3 if (grid_hw > 2 and reserved + 3 * x_block_bytes <= vmem_limit) else 2

    # Zero-cost, contiguous layout views (no transpose, no extra HBM pass):
    # pixels on the reduction axis, interleaved RGB*time on the lane axis, and a
    # leading batch-block axis so every BlockSpec dim stays (8,128)-friendly.
    xk = x.reshape(nb, b_tile, HW, 3 * T)
    w_op = jnp.asarray(w_np)
    m_op = jnp.asarray(m_np)

    out3 = pl.pallas_call(
        functools.partial(_chrom_kernel, t=T, hw_total=HW, mask_tail=mask_tail),
        out_shape=jax.ShapeDtypeStruct((nb, b_tile, Tp), jnp.float32),
        grid=(nb, grid_hw),                            # reduction (HW) axis last
        in_specs=[
            _spec_with_buffers((None, b_tile, hw_tile, 3 * T),
                               lambda b, h: (b, 0, h, 0), x_bufs),
            _spec_with_buffers((3 * T, 3 * T), lambda b, h: (0, 0), const_bufs),
            _spec_with_buffers((T, Tp), lambda b, h: (0, 0), const_bufs),
        ],
        out_specs=pl.BlockSpec((None, b_tile, Tp), lambda b, h: (b, 0, 0)),
        scratch_shapes=[pltpu.VMEM((b_tile, 1, 3 * T), jnp.float32)],
        compiler_params=pltpu.CompilerParams(
            dimension_semantics=("parallel", "arbitrary"),
            vmem_limit_bytes=int(vmem_limit),
        ),
    )(xk, w_op, m_op)

    return out3.reshape(B, Tp)[:, :T]


# --------------------------------------------------------------------------- #
# Pure-JAX reference (mirrors the PyTorch module)
# --------------------------------------------------------------------------- #
def chrom_reference(x, fs: float = 30.0, low: float = 0.7, high: float = 2.5):
    B, H, W, T, C = x.shape
    x_mean = x.mean(axis=1).mean(axis=1)                  # (B, T, 3)
    sum_rgb = x_mean.sum(axis=2, keepdims=True) + 1e-8
    Xn = x_mean / sum_rgb
    R, G, Bc = Xn[..., 0], Xn[..., 1], Xn[..., 2]
    X_ = 3.0 * R - 2.0 * G
    Y_ = 1.5 * R + G - 1.5 * Bc
    std_X = jnp.std(X_, axis=1, ddof=1, keepdims=True)
    std_Y = jnp.std(Y_, axis=1, ddof=1, keepdims=True) + 1e-8
    alpha = std_X / std_Y
    s = X_ - alpha * Y_
    freq = jnp.fft.rfftfreq(T, d=1.0 / fs)
    mask = (freq >= low) & (freq <= high)
    S = jnp.fft.rfft(s, axis=1) * mask[None, :]
    return jnp.fft.irfft(S, n=T, axis=1)


if __name__ == "__main__":
    key = jax.random.PRNGKey(0)
    # small shapes consistent with the module: B=2, H=W=8, T=32, C=3
    x = jax.random.uniform(key, (2, 8, 8, 32, 3), dtype=jnp.float32)

    out = jax.block_until_ready(chrom_forward(x))
    ref = chrom_reference(x)

    assert out.shape == (2, 32), out.shape
    # exact division + precision=HIGHEST matmuls -> observed error is ~1e-6
    assert bool(jnp.allclose(out, ref, atol=1e-3, rtol=1e-3)), "mismatch vs reference"

    print("KERNEL_OK")
</pallas_src>

<mosaic_0001>
module attributes {stable_mosaic.version = 11 : i64} {
  func.func @_chrom_kernel(%arg0: i32, %arg1: i32, %arg2: memref<1x1x64x96xf32, #tpu.memory_space<vmem>>, %arg3: memref<96x96xf32, #tpu.memory_space<vmem>>, %arg4: memref<32x128xf32, #tpu.memory_space<vmem>>, %arg5: memref<1x1x128xf32, #tpu.memory_space<vmem>>, %arg6: memref<1x1x96xf32, #tpu.memory_space<vmem>>) attributes {dimension_semantics = [#tpu.dimension_semantics<parallel>, #tpu.dimension_semantics<arbitrary>], iteration_bounds = array<i64: 2, 1>, scalar_prefetch = 0 : i64, scratch_operands = 1 : i64, tpu.core_type = #tpu.core_type<tc>, window_params = [{transform_indices = @transform_0, window_bounds = array<i64: 1, 1, 64, 96>}, {pipeline_mode = #tpu.pipeline_mode<synchronous>, transform_indices = @transform_1, window_bounds = array<i64: 96, 96>}, {pipeline_mode = #tpu.pipeline_mode<synchronous>, transform_indices = @transform_2, window_bounds = array<i64: 32, 128>}, {transform_indices = @transform_3, window_bounds = array<i64: 1, 1, 128>}]} {
    %c0_i32 = arith.constant 0 : i32
    %0 = arith.cmpi eq, %arg1, %c0_i32 : i32
    %1 = arith.extui %0 : i1 to i32
    %c0_i32_0 = arith.constant 0 : i32
    %2 = arith.cmpi ne, %1, %c0_i32_0 : i32
    scf.if %2 {
      %cst_12 = arith.constant 0.000000e+00 : f32
      %13 = vector.broadcast %cst_12 : f32 to vector<1x1x96xf32>
      %c0_13 = arith.constant 0 : index
      %c0_14 = arith.constant 0 : index
      %c0_15 = arith.constant 0 : index
      %14 = vector.load %arg6[%c0_13, %c0_14, %c0_15] : memref<1x1x96xf32, #tpu.memory_space<vmem>>, vector<1x1x96xf32>
      tpu.vector_store %arg6[%c0_13, %c0_14, %c0_15], %13 {strides = array<i32>} : memref<1x1x96xf32, #tpu.memory_space<vmem>>, vector<1x1x96xf32>,
    } else {
    }
    %c0 = arith.constant 0 : index
    %c0_1 = arith.constant 0 : index
    %c0_2 = arith.constant 0 : index
    %c0_3 = arith.constant 0 : index
    %3 = vector.load %arg2[%c0, %c0_1, %c0_2, %c0_3] : memref<1x1x64x96xf32, #tpu.memory_space<vmem>>, vector<1x1x64x96xf32>
    %4 = vector.shape_cast %3 : vector<1x1x64x96xf32> to vector<1x64x96xf32>
    %c0_4 = arith.constant 0 : index
    %c0_5 = arith.constant 0 : index
    %c0_6 = arith.constant 0 : index
    %5 = vector.load %arg6[%c0_4, %c0_5, %c0_6] : memref<1x1x96xf32, #tpu.memory_space<vmem>>, vector<1x1x96xf32>
    %cst = arith.constant dense<0.000000e+00> : vector<1x96xf32>
    %6 = vector.multi_reduction <add>, %4, %cst [1] : vector<1x64x96xf32> to vector<1x96xf32>
    %7 = vector.shape_cast %6 : vector<1x96xf32> to vector<1x1x96xf32>
    %8 = arith.addf %5, %7 : vector<1x1x96xf32>
    %c0_7 = arith.constant 0 : index
    %c0_8 = arith.constant 0 : index
    %c0_9 = arith.constant 0 : index
    %9 = vector.load %arg6[%c0_7, %c0_8, %c0_9] : memref<1x1x96xf32, #tpu.memory_space<vmem>>, vector<1x1x96xf32>
    tpu.vector_store %arg6[%c0_7, %c0_8, %c0_9], %8 {strides = array<i32>} : memref<1x1x96xf32, #tpu.memory_space<vmem>>, vector<1x1x96xf32>,
    %c0_i32_10 = arith.constant 0 : i32
    %10 = arith.cmpi eq, %arg1, %c0_i32_10 : i32
    %11 = arith.extui %10 : i1 to i32
    %c0_i32_11 = arith.constant 0 : i32
    %12 = arith.cmpi ne, %11, %c0_i32_11 : i32
    scf.if %12 {
      %c0_12 = arith.constant 0 : index
      %c0_13 = arith.constant 0 : index
      %c0_14 = arith.constant 0 : index
      %13 = vector.load %arg6[%c0_12, %c0_13, %c0_14] : memref<1x1x96xf32, #tpu.memory_space<vmem>>, vector<1x1x96xf32>
      %14 = vector.shape_cast %13 : vector<1x1x96xf32> to vector<1x96xf32>
      %c0_15 = arith.constant 0 : index
      %c0_16 = arith.constant 0 : index
      %15 = vector.load %arg3[%c0_15, %c0_16] : memref<96x96xf32, #tpu.memory_space<vmem>>, vector<96x96xf32>
      %cst_17 = arith.constant dense<0.000000e+00> : vector<1x96xf32>
      %16 = tpu.matmul %14, %15, %cst_17 {dimension_numbers = #tpu.dot_dimension_numbers<[1], [0], [0], [1], [0, 0, 1, 1], [], []>, precision = #tpu.contract_precision<fp32>} : vector<1x96xf32>, vector<96x96xf32>, vector<1x96xf32> -> vector<1x96xf32>
      %17 = vector.extract_strided_slice %16 {offsets = [0, 0], sizes = [1, 32], strides = [1, 1]} : vector<1x96xf32> to vector<1x32xf32>
      %18 = vector.extract_strided_slice %16 {offsets = [0, 32], sizes = [1, 32], strides = [1, 1]} : vector<1x96xf32> to vector<1x32xf32>
      %19 = vector.extract_strided_slice %16 {offsets = [0, 64], sizes = [1, 32], strides = [1, 1]} : vector<1x96xf32> to vector<1x32xf32>
      %cst_18 = arith.constant 9.99999993E-9 : f32
      %20 = vector.broadcast %cst_18 : f32 to vector<1x32xf32>
      %21 = arith.addf %19, %20 : vector<1x32xf32>
      %22 = arith.divf %17, %21 : vector<1x32xf32>
      %23 = arith.divf %18, %21 : vector<1x32xf32>
      %cst_19 = arith.constant dense<0.000000e+00> : vector<1xf32>
      %24 = vector.multi_reduction <add>, %22, %cst_19 [1] : vector<1x32xf32> to vector<1xf32>
      %25 = vector.shape_cast %24 : vector<1xf32> to vector<1x1xf32>
      %cst_20 = arith.constant 3.125000e-02 : f32
      %26 = vector.broadcast %cst_20 : f32 to vector<1x1xf32>
      %27 = arith.mulf %25, %26 : vector<1x1xf32>
      %28 = vector.broadcast %27 : vector<1x1xf32> to vector<1x32xf32>
      %29 = arith.subf %22, %28 : vector<1x32xf32>
      %30 = arith.mulf %29, %29 : vector<1x32xf32>
      %cst_21 = arith.constant dense<0.000000e+00> : vector<1xf32>
      %31 = vector.multi_reduction <add>, %30, %cst_21 [1] : vector<1x32xf32> to vector<1xf32>
      %32 = vector.shape_cast %31 : vector<1xf32> to vector<1x1xf32>
      %cst_22 = arith.constant 0.0322580636 : f32
      %33 = vector.broadcast %cst_22 : f32 to vector<1x1xf32>
      %34 = arith.mulf %32, %33 : vector<1x1xf32>
      %35 = math.sqrt %34 : vector<1x1xf32>
      %cst_23 = arith.constant dense<0.000000e+00> : vector<1xf32>
      %36 = vector.multi_reduction <add>, %23, %cst_23 [1] : vector<1x32xf32> to vector<1xf32>
      %37 = vector.shape_cast %36 : vector<1xf32> to vector<1x1xf32>
      %cst_24 = arith.constant 3.125000e-02 : f32
      %38 = vector.broadcast %cst_24 : f32 to vector<1x1xf32>
      %39 = arith.mulf %37, %38 : vector<1x1xf32>
      %40 = vector.broadcast %39 : vector<1x1xf32> to vector<1x32xf32>
      %41 = arith.subf %23, %40 : vector<1x32xf32>
      %42 = arith.mulf %41, %41 : vector<1x32xf32>
      %cst_25 = arith.constant dense<0.000000e+00> : vector<1xf32>
      %43 = vector.multi_reduction <add>, %42, %cst_25 [1] : vector<1x32xf32> to vector<1xf32>
      %44 = vector.shape_cast %43 : vector<1xf32> to vector<1x1xf32>
      %cst_26 = arith.constant 0.0322580636 : f32
      %45 = vector.broadcast %cst_26 : f32 to vector<1x1xf32>
      %46 = arith.mulf %44, %45 : vector<1x1xf32>
      %47 = math.sqrt %46 : vector<1x1xf32>
      %cst_27 = arith.constant 9.99999993E-9 : f32
      %48 = vector.broadcast %cst_27 : f32 to vector<1x1xf32>
      %49 = arith.addf %47, %48 : vector<1x1xf32>
      %50 = arith.divf %35, %49 : vector<1x1xf32>
      %51 = vector.broadcast %50 : vector<1x1xf32> to vector<1x32xf32>
      %52 = arith.mulf %51, %23 : vector<1x32xf32>
      %53 = arith.subf %22, %52 : vector<1x32xf32>
      %c0_28 = arith.constant 0 : index
      %c0_29 = arith.constant 0 : index
      %54 = vector.load %arg4[%c0_28, %c0_29] : memref<32x128xf32, #tpu.memory_space<vmem>>, vector<32x128xf32>
      %cst_30 = arith.constant dense<0.000000e+00> : vector<1x128xf32>
      %55 = tpu.matmul %53, %54, %cst_30 {dimension_numbers = #tpu.dot_dimension_numbers<[1], [0], [0], [1], [0, 0, 1, 1], [], []>, precision = #tpu.contract_precision<fp32>} : vector<1x32xf32>, vector<32x128xf32>, vector<1x128xf32> -> vector<1x128xf32>
      %c0_31 = arith.constant 0 : index
      %c0_32 = arith.constant 0 : index
      %c0_33 = arith.constant 0 : index
      %56 = vector.load %arg5[%c0_31, %c0_32, %c0_33] : memref<1x1x128xf32, #tpu.memory_space<vmem>>, vector<1x1x128xf32>
      %57 = vector.shape_cast %56 : vector<1x1x128xf32> to vector<1x128xf32>
      %58 = vector.shape_cast %55 : vector<1x128xf32> to vector<1x1x128xf32>
      tpu.vector_store %arg5[%c0_31, %c0_32, %c0_33], %58 {strides = array<i32>} : memref<1x1x128xf32, #tpu.memory_space<vmem>>, vector<1x1x128xf32>,
    } else {
    }
    return
  }
  func.func @transform_0(%arg0: i32, %arg1: i32) -> (i32, i32, i32, i32) {
    %c0_i32 = arith.constant 0 : i32
    %c0_i32_0 = arith.constant 0 : i32
    %c0_i32_1 = arith.constant 0 : i32
    return %arg0, %c0_i32, %arg1, %c0_i32_0 : i32, i32, i32, i32
  }
  func.func @transform_1(%arg0: i32, %arg1: i32) -> (i32, i32) {
    %c0_i32 = arith.constant 0 : i32
    %c0_i32_0 = arith.constant 0 : i32
    %c0_i32_1 = arith.constant 0 : i32
    return %c0_i32, %c0_i32_0 : i32, i32
  }
  func.func @transform_2(%arg0: i32, %arg1: i32) -> (i32, i32) {
    %c0_i32 = arith.constant 0 : i32
    %c0_i32_0 = arith.constant 0 : i32
    %c0_i32_1 = arith.constant 0 : i32
    return %c0_i32, %c0_i32_0 : i32, i32
  }
  func.func @transform_3(%arg0: i32, %arg1: i32) -> (i32, i32, i32) {
    %c0_i32 = arith.constant 0 : i32
    %c0_i32_0 = arith.constant 0 : i32
    %c0_i32_1 = arith.constant 0 : i32
    return %arg0, %c0_i32, %c0_i32_0 : i32, i32, i32
  }
}

</mosaic_0001>

<bundles_post_ra>
// kernel: tpu_custom_call.1
= control target key start
LH: loop header
LB: loop body
LE: loop exit
PB: predicated region body
PF: predicated region fallthrough
CT: control target
= control target key end

     0   :  { %8 = vsyncpa [#allocation4], 0  ;;  %s2775_s0 = inlined_call_operand.hbm [shape: f32[2,1,64,96], index: 0, kind: input, shape index: {}]   ;;  %s2776_s1 = inlined_call_operand.hbm [shape: f32[96,96], index: 1, kind: input, shape index: {}]   ;;  %s2777_s2 = inlined_call_operand.hbm [shape: f32[32,128], index: 2, kind: input, shape index: {}]   ;;  %s2778_s3 = inlined_call_operand.hbm [shape: f32[2,1,128], index: 3, kind: output, shape index: {}]  }
   0x1   :  { %10 = vsyncpa [#allocation4 + $0x1], 0 }
   0x2   :  { %11 = vsyncpa [#allocation7], 0 }
   0x3   :  { %12 = vsyncpa [#allocation5], 0 }
   0x4   :  { %14 = vsyncpa [#allocation5 + $0x1], 0  ;;  %s2197_s12 = smov 0   ;;  %s2199_s13 = smov 0  }
   0x5   :  { %s2201_s14 = smov 0   ;;  %s2203_s15 = smov 0  }
   0x6   :  { %s2205_s16 = smov 0   ;;  %s2207_s17 = smov 0  }
   0x7 LB: > { %s1549_s18 = sadd.s32 4294967295, %s2165_s17   ;;  %s1550_s19 = sadd.s32 4294967294, %s2165_s17   ;;  %s2165_s17 = sphi %s2207_s17, %s20_s17   ;;  %s2161_s16 = sphi %s2205_s16, %s2795_s16   ;;  %s2157_s15 = sphi %s2203_s15, %s2794_s15   ;;  %s2153_s14 = sphi %s2201_s14, %s2793_s14   ;;  %s2149_s13 = sphi %s2199_s13, %s2792_s13   ;;  %s2145_s12 = sphi %s2197_s12, %s2791_s12  }
   0x8   : > { %p54_p0 = scmp.ne.s32.totalorder %s2149_s13, %s2145_s12  ;;  %p2231_p1 = scmp.eq.s32.totalorder %s1549_s18, 0 }
   0x9   : > { %p2235_p2 = scmp.eq.s32.totalorder %s1549_s18, 1  ;;  %p126_p3 = scmp.eq.s32.totalorder %s1550_s19, 1 }
   0xa   : > { %p2241_p4 = por %p2231_p1, %p54_p0  ;;  %p1551_p5 = scmp.ge.s32.totalorder %s2165_s17, 1 }
   0xb   : > { %p2246_p6 = por %p126_p3, %p54_p0  ;;  %p133_p7 = scmp.lt.s32.totalorder %s2165_s17, 3 }
   0xc   : > { %s2167_s25 = smov [#allocation6]   ;;  %s2168_s28 = smov [#allocation8]  }
   0xd   : > { %s2783_s23 = scalar_select %p2246_p6, 1, 0 }
   0xe   : > { %p2251_p8 = pnand %p1551_p5, %p133_p7  ;;  %s145_s26 = sshll.u32 %s2167_s25, 4  ;;  %s146_s26 = int_to_ptr.vmem [resolvable:$true] %s145_s26 }
   0xf   : > { %s158_s29 = sshll.u32 %s2168_s28, 4  ;;  %s2012_s30 = scalar_lea.vmem %s146_s26, 1536  ;;  %s159_s29 = int_to_ptr.vmem [resolvable:$true] %s158_s29 }
  0x10   : > { %p1914_p9 = pneg %p2251_p8  ;;  %p2013_p13 = scmp.ne.s32.totalorder %s146_s26, %s2012_s30 }
  0x11   : > { %p2020_p5 = scmp.lt.s32.totalorder %s146_s26, %s146_s26  ;;  %p2021_p7 = scmp.lt.s32.totalorder %s2012_s30, %s2012_s30 }
  0x12   : > { %p2260_p11 = pnand %p1914_p9, %p2231_p1 }
  0x13   : > { %p2022_p10 = por %p2021_p7, %p2020_p5 }
  0x14   : > { %p2003_p12 = pneg %p2260_p11 }
  0x16   : > { %p2015_p0 = pnand %p2013_p13, %p2003_p12 }
  0x18   : > { %p2016_p3 = pneg %p2015_p0 }
  0x1a   : > { %p2023_p9 = pnand %p2022_p10, %p2016_p3 }
  0x1c   : > { %2026 = shalt.err (!%p2023_p9)
}
  0x1d   : > { %s2779_s4 = smov 128   ;;  %s2170_s5 = smov 8  }
  0x1e   : > { %1917 = dma.hbm_to_vmem [thread:$0]  (!%p2260_p11), %s2776_s1, 1536, %s146_s26, [#allocation7], %s2779_s4, %s2779_s4, %s2170_s5  }
  0x1f   : > { %s2038_s8 = scalar_lea.vmem %s159_s29, 512  ;;  %p2046_p10 = scmp.lt.s32.totalorder %s159_s29, %s159_s29 }
  0x20   : > { %p2039_p13 = scmp.ne.s32.totalorder %s159_s29, %s2038_s8  ;;  %p2047_p3 = scmp.lt.s32.totalorder %s2038_s8, %s2038_s8 }
  0x22   : > { %p2041_p0 = pnand %p2039_p13, %p2003_p12  ;;  %p2048_p7 = por %p2047_p3, %p2046_p10 }
  0x24   : > { %p2042_p5 = pneg %p2041_p0 }
  0x26   : > { %p2049_p9 = pnand %p2048_p7, %p2042_p5 }
  0x28   : > { %2052 = shalt.err (!%p2049_p9)
}
  0x29   : > { %1920 = dma.hbm_to_vmem [thread:$0]  (!%p2260_p11), %s2777_s2, 512, %s159_s29, [#allocation7], %s2779_s4, %s2779_s4, %s2170_s5  }
  0x2a   : > { %s32_s11 = sadd.s32 1, %s2161_s16  ;;  %s41_s18 = sadd.s32 1, %s2153_s14 }
  0x2b   : > { %p34_p12 = scmp.ge.s32.totalorder %s32_s11, 2  ;;  %p48_p13 = scmp.ne.s32.totalorder %s2153_s14, %s2149_s13 }
  0x2c   : > { %p49_p0 = scmp.eq.s32.totalorder %s2165_s17, 0  ;;  %p1931_p5 = scmp.lt.s32.totalorder %s2165_s17, 2 }
  0x2d   : > { %s2797_s11 = smov (%p34_p12, %s32_s11), 0  ;;  %p2298_p3 = por %p2235_p2, %p48_p13 }
  0x2e   : > { %p50_p10 = por %p49_p0, %p48_p13  ;;  %s36_s25 = ssub.s32 %s2161_s16, %s2797_s11 }
  0x2f   : > { %s172_s26 = sand.u32 1, %s2153_s14   ;;  %p39_p7 = scmp.eq.s32.totalorder %s36_s25, 0 }
  0x30   : > { %s1555_s27 = sshll.u32 %s172_s26, 6  ;;  %s1565_s28 = sshll.u32 %s2161_s16, 10 }
  0x31   : > { %s2307_s29 = scalar_select %p39_p7, %s2153_s14, %s41_s18  }
  0x32   : > { %s184_s7 = scalar_lea.hbm %s2775_s0, %s1565_s28  ;;  %s176_s8 = scalar_lea.vmem [#allocation3], %s1555_s27 }
  0x33   : > { %s185_s9 = sshll.u32 %s176_s8, 4  ;;  %p2314_p11 = pnand %p1931_p5, %p50_p10  ;;  %s186_s9 = int_to_ptr.vmem [resolvable:$true] %s185_s9 }
  0x34   : > { %s173_s10 = scalar_lea.sflag [#allocation4], %s172_s26  ;;  %s2066_s25 = scalar_lea.vmem %s186_s9, 1024 }
  0x35   : > { %p2055_p2 = pneg %p2314_p11  ;;  %p2067_p9 = scmp.ne.s32.totalorder %s186_s9, %s2066_s25 }
  0x36   : > { %s2171_s18 = smov [#allocation3]  }
  0x37   : > { %p2069_p12 = pnand %p2067_p9, %p2055_p2  ;;  %s2071_s4 = sshll.u32 %s2171_s18, 4  ;;  %s2072_s4 = int_to_ptr.vmem [resolvable:$false] %s2071_s4 }
  0x38   : > { %s2073_s28 = scalar_lea.vmem %s2072_s4, 2048  ;;  %p2074_p0 = scmp.lt.s32.totalorder %s186_s9, %s2072_s4 }
  0x39   : > { %p2070_p13 = pneg %p2069_p12  ;;  %p2075_p7 = scmp.lt.s32.totalorder %s2073_s28, %s2066_s25 }
  0x3b   : > { %p2076_p6 = por %p2075_p7, %p2074_p0 }
  0x3d   : > { %p2077_p5 = pnand %p2076_p6, %p2070_p13 }
  0x3f   : > { %2080 = shalt.err (!%p2077_p5)
}
  0x40   : > { %s2788_s27 = smov 128   ;;  %197 = sbr.rel (%p2251_p8) target bundleno = 1420 (0x58c), region = 32 }
  0x41   : > { %1924 = dma.hbm_to_vmem [thread:$0]  (!%p2314_p11), %s184_s7, 1024, %s186_s9, %s173_s10, %s2788_s27, %s2788_s27, %s2170_s5  }
  0x42   : > { %s2328_s26 = sand.u32 (!%p2251_p8), 1, %s2149_s13  }
  0x43   : > { %s1559_s4 = sshll.u32 (!%p2251_p8), %s2328_s26, 6  ;;  %s200_s30 = scalar_lea.sflag (!%p2251_p8), [#allocation4], %s2328_s26 }
  0x44   : > { %s2332_s6 = scalar_lea.vmem (!%p2251_p8), [#allocation3], %s1559_s4 }
  0x45   : > { %2132 = dma.done.wait (%p2241_p4), %s200_s30, 1024  }
  0x46   : > { %2134 = vsyncadd (%p2241_p4), %s200_s30, 4294966272 }
  0x47   : > { %2136 = dma.done.wait (%p2231_p1), [#allocation7], 2048  }
  0x48   : > { %2138 = vsyncadd (%p2231_p1), [#allocation7], 4294965248  ;;  %vm238_vm0 = vcmask 778240   ;;  %v2172_v0 = vmov 0.0   ;;  %vm2173_vm1 = vmmov 0   ;;  %v289_v1 = vld [vmem:[#allocation6 + $0x58] sm:$0xff] }
  0x49   : > { %1674 = vmatprep.subr.mxu0 %v2172_v0  ;;  %1701 = vmatprep.subr.mxu1 %v2172_v0  ;;  %239 = vst.msk [vmem:[#allocation2] sm:$0x1] %vm238_vm0, %v2172_v0  ;;  %v288_v2 = vld [vmem:[#allocation6 + $0x50] sm:$0xff]  ;;  %v287_v3 = vld [vmem:[#allocation6 + $0x48] sm:$0xff]  ;;  %v2350_v4 = vand.u32 4294901760, %v289_v1  ;;  %v286_v7 = vld [vmem:[#allocation6 + $0x40] sm:$0xff] }
  0x4a   : > { %1698 = vmatprep.mubr.msk.f32.mxu0 %vm2173_vm1, %v2172_v0  ;;  %1725 = vmatprep.mubr.msk.f32.mxu1 %vm2173_vm1, %v2172_v0  ;;  %v2352_v5 = vand.u32 4294901760, %v288_v2  ;;  %v2354_v6 = vand.u32 4294901760, %v287_v3  ;;  %v285_v8 = vld [vmem:[#allocation6 + $0x38] sm:$0xff]  ;;  %v284_v9 = vld [vmem:[#allocation6 + $0x30] sm:$0xff]  ;;  %v2356_v10 = vand.u32 4294901760, %v286_v7  ;;  %v283_v13 = vld [vmem:[#allocation6 + $0x28] sm:$0xff] }
  0x4b   : > { %v2358_v11 = vand.u32 4294901760, %v285_v8  ;;  %v2360_v12 = vand.u32 4294901760, %v284_v9  ;;  %v282_v14 = vld [vmem:[#allocation6 + $0x20] sm:$0xff]  ;;  %1675 = vmatpush3.msra.mxu0 %v2350_v4  ;;  %v2364_v15 = vsub.f32 %v289_v1, %v2350_v4  ;;  %v2372_v18 = vand.u32 4294901760, %v283_v13  ;;  %v281_v35 = vld [vmem:[#allocation6 + $0x18] sm:$0xff]  ;;  %v280_v36 = vld [vmem:[#allocation6 + $0x10] sm:$0xff] }
  0x4c   : > { %v2367_v16 = vsub.f32 %v288_v2, %v2352_v5  ;;  %v2370_v17 = vsub.f32 %v287_v3, %v2354_v6  ;;  %1676 = vmatprep.subr.mxu0 %v2172_v0  ;;  %v2376_v19 = vsub.f32 %v286_v7, %v2356_v10  ;;  %v2384_v22 = vand.u32 4294901760, %v282_v14  ;;  %v279_v37 = vld [vmem:[#allocation6 + $0x8] sm:$0xff]  ;;  %v240_v40 = vld [vmem:[%s2332_s6] sm:$0xff]  ;;  %v242_v46 = vld [vmem:[%s2332_s6 + $0x10] sm:$0xff]  ;;  %s2174_s20 = smov 64   ;;  %s2175_s22 = smov 96  }
  0x4d   : > { %v2379_v20 = vsub.f32 %v285_v8, %v2358_v11  ;;  %v2382_v21 = vsub.f32 %v284_v9, %v2360_v12  ;;  %v391_v23 = vand.u32 4294901760, %v2364_v15  ;;  %1677 = vmatpush3.msra.mxu0 %v2352_v5  ;;  %v2395_v29 = vsub.f32 %v283_v13, %v2372_v18  ;;  %v241_v41 = vld [vmem:[%s2332_s6 + $0x8] sm:$0xff]  ;;  %v278_v45 = vld [vmem:[#allocation6] sm:$0xff]  ;;  %v243_v53 = vld [vmem:[%s2332_s6 + $0x18] sm:$0xff]  ;;  %s1562_s24 = sshll.u32 %s2157_s15, 4  ;;  %s232_s5 = scalar_lea.vmem [#allocation9], %s2328_s26 }
  0x4e   : > { %v398_v24 = vand.u32 4294901760, %v2367_v16  ;;  %v405_v25 = vand.u32 4294901760, %v2370_v17  ;;  %1678 = vmatprep.subr.mxu0 %v2172_v0  ;;  %v412_v26 = vand.u32 4294901760, %v2376_v19  ;;  %v2412_v34 = vsub.f32 %v282_v14, %v2384_v22  ;;  %v244_v61 = vld [vmem:[%s2332_s6 + $0x20] sm:$0xff]  ;;  %v245_v8 = vld [vmem:[%s2332_s6 + $0x28] sm:$0xff]  ;;  %s1453_s7 = sshll.u32 %s232_s5, 4  ;;  %s1451_s21 = scalar_lea.hbm %s2778_s3, %s1562_s24  ;;  %s1454_s7 = int_to_ptr.vmem [resolvable:$true] %s1453_s7 }
  0x4f   : > { %v419_v27 = vand.u32 4294901760, %v2379_v20  ;;  %v426_v28 = vand.u32 4294901760, %v2382_v21  ;;  %v392_v30 = vsub.f32 %v2364_v15, %v391_v23  ;;  %1679 = vmatpush3.msra.mxu0 %v2354_v6  ;;  %vm249_vm2 = vcmask 785408   ;;  %s1441_s10 = scalar_lea.sflag [#allocation5], %s2328_s26  ;;  %s2081_s25 = scalar_lea.vmem %s1454_s7, 16 }
  0x50   : > { %v399_v31 = vsub.f32 %v2367_v16, %v398_v24  ;;  %v406_v32 = vsub.f32 %v2370_v17, %v405_v25  ;;  %1680 = vmatprep.subr.mxu0 %v2172_v0  ;;  %v413_v33 = vsub.f32 %v2376_v19, %v412_v26  ;;  %v433_v44 = vand.u32 4294901760, %v2395_v29  ;;  %p2082_p1 = scmp.ne.s32.totalorder %s1454_s7, %s2081_s25  ;;  %s2176_s18 = smov [#allocation9]  }
  0x51   : > { %v393_v38 = vand.u32 4294901760, %v392_v30  ;;  %1681 = vmatpush3.msra.mxu0 %v2356_v10  ;;  %v420_v42 = vsub.f32 %v2379_v20, %v419_v27  ;;  %v427_v43 = vsub.f32 %v2382_v21, %v426_v28  ;;  %v2427_v48 = vand.u32 4294901760, %v281_v35  ;;  %s2085_s28 = sshll.u32 %s2176_s18, 4  ;;  %s2086_s28 = int_to_ptr.vmem [resolvable:$false] %s2085_s28 }
  0x52   : > { %v400_v39 = vand.u32 4294901760, %v399_v31  ;;  %1682 = vmatprep.subr.mxu0 %v2172_v0  ;;  %v407_v47 = vand.u32 4294901760, %v406_v32  ;;  %v2429_v49 = vand.u32 4294901760, %v280_v36  ;;  %v2431_v50 = vand.u32 4294901760, %v279_v37  ;;  %v246_v32 = vld [vmem:[%s2332_s6 + $0x30] sm:$0xff]  ;;  %p2083_p4 = pnand %p2082_p1, %p2298_p3  ;;  %s2087_s15 = scalar_lea.vmem %s2086_s28, 32 }
  0x53   : > { %1702 = vmatpush3.msra.mxu1 %v393_v38  ;;  %1683 = vmatpush3.msra.mxu0 %v2358_v11  ;;  %v414_v51 = vand.u32 4294901760, %v413_v33  ;;  %v440_v52 = vand.u32 4294901760, %v2412_v34  ;;  %v250_v54 = vsel %vm249_vm2, %v240_v40, 0.0  ;;  %v251_v55 = vsel %vm249_vm2, %v241_v41, 0.0  ;;  %p2088_p8 = scmp.lt.s32.totalorder %s1454_s7, %s2086_s28  ;;  %p2089_p10 = scmp.lt.s32.totalorder %s2087_s15, %s2081_s25 }
  0x54   : > { %1703 = vmatprep.subr.mxu1 %v2172_v0  ;;  %1684 = vmatprep.subr.mxu0 %v2172_v0  ;;  %v2441_v56 = vsub.f32 %v281_v35, %v2427_v48  ;;  %v2444_v57 = vsub.f32 %v280_v36, %v2429_v49  ;;  %v2446_v58 = vand.u32 4294901760, %v278_v45  ;;  %v253_v59 = vsel %vm249_vm2, %v242_v46, 0.0  ;;  %p2084_p6 = pneg %p2083_p4 }
  0x55   : > { %1704 = vmatpush3.msra.mxu1 %v400_v39  ;;  %1685 = vmatpush3.msra.mxu0 %v2360_v12  ;;  %v434_v60 = vsub.f32 %v2395_v29, %v433_v44  ;;  %v252_v62 = vadd.f32 %v251_v55, %v250_v54  ;;  %v421_v63 = vand.u32 4294901760, %v420_v42  ;;  %v2458_v2 = vsub.f32 %v279_v37, %v2431_v50  ;;  %v247_v39 = vld [vmem:[%s2332_s6 + $0x38] sm:$0xff]  ;;  %p2090_p11 = por %p2089_p10, %p2088_p8 }
  0x56   : > { %1705 = vmatprep.subr.mxu1 %v2172_v0  ;;  %1686 = vmatprep.subr.mxu0 %v2172_v0  ;;  %v447_v1 = vand.u32 4294901760, %v2441_v56  ;;  %v255_v3 = vsel %vm249_vm2, %v243_v53, 0.0  ;;  %v428_v7 = vand.u32 4294901760, %v427_v43  ;;  %v441_v13 = vsub.f32 %v2412_v34, %v440_v52 }
  0x57   : > { %1706 = vmatpush3.msra.mxu1 %v407_v47  ;;  %1687 = vmatpush3.msra.mxu0 %v2372_v18  ;;  %v254_v9 = vadd.f32 %v253_v59, %v252_v62  ;;  %v454_v14 = vand.u32 4294901760, %v2444_v57  ;;  %v2470_v30 = vsub.f32 %v278_v45, %v2446_v58  ;;  %v257_v31 = vsel %vm249_vm2, %v244_v61, 0.0  ;;  %p2091_p2 = pnand %p2090_p11, %p2084_p6 }
  0x58   : > { %1707 = vmatprep.subr.mxu1 %v2172_v0  ;;  %1688 = vmatprep.subr.mxu0 %v2172_v0  ;;  %v435_v35 = vand.u32 4294901760, %v434_v60  ;;  %v448_v36 = vsub.f32 %v2441_v56, %v447_v1  ;;  %v461_v37 = vand.u32 4294901760, %v2458_v2  ;;  %v259_v38 = vsel %vm249_vm2, %v245_v8, 0.0 }
  0x59   : > { %1708 = vmatpush3.msra.mxu1 %v414_v51  ;;  %1689 = vmatpush3.msra.mxu0 %v2384_v22  ;;  %v256_v33 = vadd.f32 %v255_v3, %v254_v9  ;;  %v442_v41 = vand.u32 4294901760, %v441_v13  ;;  %v455_v42 = vsub.f32 %v2444_v57, %v454_v14  ;;  %v468_v43 = vand.u32 4294901760, %v2470_v30  ;;  %v248_v13 = vld [vmem:[#allocation2] sm:$0x1] }
  0x5a   : > { %1709 = vmatprep.subr.mxu1 %v2172_v0  ;;  %1690 = vmatprep.subr.mxu0 %v2172_v0  ;;  %v261_v45 = vsel %vm249_vm2, %v246_v32, 0.0  ;;  %v449_v47 = vand.u32 4294901760, %v448_v36  ;;  %v462_v51 = vsub.f32 %v2458_v2, %v461_v37  ;;  %v263_v53 = vsel %vm249_vm2, %v247_v39, 0.0 }
  0x5b   : > { %1710 = vmatpush3.msra.mxu1 %v421_v63  ;;  %1691 = vmatpush3.msra.mxu0 %v2427_v48  ;;  %v258_v40 = vadd.f32 %v257_v31, %v256_v33  ;;  %v456_v55 = vand.u32 4294901760, %v455_v42  ;;  %v469_v59 = vsub.f32 %v2470_v30, %v468_v43  ;;  %vm894_vm3 = vcmask 253952  }
  0x5c   : > { %1711 = vmatprep.subr.mxu1 %v2172_v0  ;;  %1692 = vmatprep.subr.mxu0 %v2172_v0  ;;  %v463_v61 = vand.u32 4294901760, %v462_v51  ;;  %vm950_vm8 = vcmask 261120  }
  0x5d   : > { %1712 = vmatpush3.msra.mxu1 %v428_v7  ;;  %1693 = vmatpush3.msra.mxu0 %v2429_v49  ;;  %v260_v46 = vadd.f32 %v259_v38, %v258_v40  ;;  %v470_v63 = vand.u32 4294901760, %v469_v59 }
  0x5e   : > { %1713 = vmatprep.subr.mxu1 %v2172_v0  ;;  %1694 = vmatprep.subr.mxu0 %v2172_v0 }
  0x5f   : > { %1714 = vmatpush3.msra.mxu1 %v435_v35  ;;  %1695 = vmatpush3.msra.mxu0 %v2431_v50  ;;  %v262_v54 = vadd.f32 %v261_v45, %v260_v46  ;;  %v949_v46 = vld [vmem:[#allocation8 + $0x18] sm:$0xff] }
  0x60   : > { %1715 = vmatprep.subr.mxu1 %v2172_v0  ;;  %1696 = vmatprep.subr.mxu0 %v2172_v0  ;;  %v2653_v51 = vand.u32 4294901760, %v949_v46 }
  0x61   : > { %1716 = vmatpush3.msra.mxu1 %v442_v41  ;;  %1697 = vmatpush3.msra.mxu0 %v2446_v58  ;;  %v264_v60 = vadd.f32 %v263_v53, %v262_v54 }
  0x62   : > { %1717 = vmatprep.subr.mxu1 %v2172_v0  ;;  %1728 = vmatprep.subr.mxu0 %v2172_v0  ;;  %v2658_v54 = vsub.f32 %v949_v46, %v2653_v51 }
  0x63   : > { %1718 = vmatpush3.msra.mxu1 %v449_v47  ;;  %v265_v62 = vrot.slane %v264_v60, 4  ;;  %v948_v47 = vld [vmem:[#allocation8 + $0x10] sm:$0xff] }
  0x64   : > { %1719 = vmatprep.subr.mxu1 %v2172_v0  ;;  %v2655_v53 = vand.u32 4294901760, %v948_v47  ;;  %v1060_v59 = vand.u32 4294901760, %v2658_v54 }
  0x65   : > { %1720 = vmatpush3.msra.mxu1 %v456_v55  ;;  %v266_v3 = vadd.f32 %v265_v62, %v264_v60 }
  0x66   : > { %1721 = vmatprep.subr.mxu1 %v2172_v0  ;;  %v2661_v55 = vsub.f32 %v948_v47, %v2655_v53 }
  0x67   : > { %1722 = vmatpush3.msra.mxu1 %v463_v61  ;;  %v267_v7 = vrot.slane %v266_v3, 2  ;;  %v1061_v61 = vsub.f32 %v2658_v54, %v1060_v59 }
  0x68   : > { %1723 = vmatprep.subr.mxu1 %v2172_v0  ;;  %v1067_v60 = vand.u32 4294901760, %v2661_v55 }
  0x69   : > { %1724 = vmatpush3.msra.mxu1 %v470_v63  ;;  %v268_v8 = vadd.f32 %v267_v7, %v266_v3  ;;  %v1062_v63 = vand.u32 4294901760, %v1061_v61 }
  0x6a   : > { %1755 = vmatprep.subr.mxu1 %v2172_v0  ;;  %v1068_v62 = vsub.f32 %v2661_v55, %v1067_v60 }
  0x6b   : > { %v269_v9 = vrot.slane %v268_v8, 1 }
  0x6c   : > { %v1069_v3 = vand.u32 4294901760, %v1068_v62 }
  0x6d   : > { %v270_v31 = vadd.f32 %v269_v9, %v268_v8 }
  0x6f   : > { %v271_v32 = vadd.f32 %v270_v31, %v248_v13 }
  0x71   : > { %273 = vst.msk [vmem:[#allocation2] sm:$0x1] %vm238_vm0, %v271_v32 }
  0x78   : > { %v277_v33 = vld [vmem:[#allocation2] sm:$0x1] }
  0x79   : > { %v291_v35 = vsel %vm249_vm2, %v277_v33, 0 }
  0x7a   : > { %v2512_v36 = vand.u32 4294901760, %v291_v35 }
  0x7c   : > { %v371_v38 = vsub.f32 %v291_v35, %v2512_v36  ;;  %1726 = vmatmul.mubr.f32.vlgmr.msra.gmra.mxu1 %v2512_v36  ;;  %v947_v35 = vld [vmem:[#allocation8 + $0x8] sm:$0xff] }
  0x7d   : > { %1756 = vmatpush3.msra.mxu1 %v2350_v4  ;;  %1779 = vmatprep.mubr.msk.f32.mxu1 %vm2173_vm1, %v2172_v0 }
  0x7e   : > { %v372_v39 = vand.u32 4294901760, %v371_v38  ;;  %1757 = vmatprep.subr.mxu1 %v2172_v0 }
  0x7f   : > { %1758 = vmatpush3.msra.mxu1 %v2352_v5 }
  0x80   : > { %v373_v40 = vsub.f32 %v371_v38, %v372_v39  ;;  %1759 = vmatprep.subr.mxu1 %v2172_v0 }
  0x81   : > { %1760 = vmatpush3.msra.mxu1 %v2354_v6 }
  0x82   : > { %v374_v41 = vand.u32 4294901760, %v373_v40  ;;  %1761 = vmatprep.subr.mxu1 %v2172_v0  ;;  %v946_v40 = vld [vmem:[#allocation8] sm:$0xff] }
  0x83   : > { %1762 = vmatpush3.msra.mxu1 %v2356_v10 }
  0x84   : > { %1699 = vmatmul.mubr.f32.vlgmr.msra.gmra.mxu0 %v374_v41  ;;  %1763 = vmatprep.subr.mxu1 %v2172_v0 }
  0x85   : > { %1729 = vmatpush3.msra.mxu0 %v2364_v15  ;;  %1764 = vmatpush3.msra.mxu1 %v2358_v11 }
  0x86   : > { %1730 = vmatprep.subr.mxu0 %v2172_v0  ;;  %1765 = vmatprep.subr.mxu1 %v2172_v0 }
  0x87   : > { %1731 = vmatpush3.msra.mxu0 %v2367_v16  ;;  %1766 = vmatpush3.msra.mxu1 %v2360_v12 }
  0x88   : > { %1732 = vmatprep.subr.mxu0 %v2172_v0  ;;  %1767 = vmatprep.subr.mxu1 %v2172_v0 }
  0x89   : > { %1733 = vmatpush3.msra.mxu0 %v2370_v17  ;;  %1768 = vmatpush3.msra.mxu1 %v2372_v18 }
  0x8a   : > { %1734 = vmatprep.subr.mxu0 %v2172_v0  ;;  %1769 = vmatprep.subr.mxu1 %v2172_v0 }
  0x8b   : > { %1735 = vmatpush3.msra.mxu0 %v2376_v19  ;;  %1770 = vmatpush3.msra.mxu1 %v2384_v22 }
  0x8c   : > { %1736 = vmatprep.subr.mxu0 %v2172_v0  ;;  %1771 = vmatprep.subr.mxu1 %v2172_v0 }
  0x8d   : > { %1737 = vmatpush3.msra.mxu0 %v2379_v20  ;;  %1772 = vmatpush3.msra.mxu1 %v2427_v48 }
  0x8e   : > { %1738 = vmatprep.subr.mxu0 %v2172_v0  ;;  %1773 = vmatprep.subr.mxu1 %v2172_v0 }
  0x8f   : > { %1739 = vmatpush3.msra.mxu0 %v2382_v21  ;;  %1774 = vmatpush3.msra.mxu1 %v2429_v49 }
  0x90   : > { %1740 = vmatprep.subr.mxu0 %v2172_v0  ;;  %1775 = vmatprep.subr.mxu1 %v2172_v0 }
  0x91   : > { %1741 = vmatpush3.msra.mxu0 %v2395_v29  ;;  %1776 = vmatpush3.msra.mxu1 %v2431_v50 }
  0x92   : > { %1742 = vmatprep.subr.mxu0 %v2172_v0  ;;  %1777 = vmatprep.subr.mxu1 %v2172_v0 }
  0x93   : > { %1743 = vmatpush3.msra.mxu0 %v2412_v34  ;;  %1752 = vmatprep.mubr.msk.f32.mxu0 %vm2173_vm1, %v2172_v0 }
  0x94   : > { %1744 = vmatprep.subr.mxu0 %v2172_v0  ;;  %1778 = vmatpush3.msra.mxu1 %v2446_v58 }
  0x95   : > { %1745 = vmatpush3.msra.mxu0 %v2441_v56  ;;  %1809 = vmatprep.subr.mxu1 %v2172_v0 }
  0x96   : > { %1746 = vmatprep.subr.mxu0 %v2172_v0  ;;  %1780 = vmatmul.mubr.f32.vlgmr.msra.gmra.mxu1 %v372_v39 }
  0x97   : > { %1747 = vmatpush3.msra.mxu0 %v2444_v57  ;;  %1810 = vmatpush3.msra.mxu1 %v2350_v4 }
  0x98   : > { %1748 = vmatprep.subr.mxu0 %v2172_v0  ;;  %1811 = vmatprep.subr.mxu1 %v2172_v0 }
  0x99   : > { %1749 = vmatpush3.msra.mxu0 %v2458_v2  ;;  %1812 = vmatpush3.msra.mxu1 %v2352_v5 }
  0x9a   : > { %1750 = vmatprep.subr.mxu0 %v2172_v0  ;;  %1813 = vmatprep.subr.mxu1 %v2172_v0 }
  0x9b   : > { %1751 = vmatpush3.msra.mxu0 %v2470_v30  ;;  %1814 = vmatpush3.msra.mxu1 %v2354_v6 }
  0x9c   : > { %1753 = vmatmul.mubr.f32.vlgmr.msra.gmra.mxu0 %v371_v38  ;;  %1782 = vmatprep.subr.mxu0 %v2172_v0  ;;  %v985_v38 = vand.u32 4294901760, %v947_v35 }
  0x9d   : > { %1783 = vmatpush3.msra.mxu0 %v391_v23  ;;  %1815 = vmatprep.subr.mxu1 %v2172_v0 }
  0x9e   : > { %1784 = vmatprep.subr.mxu0 %v2172_v0  ;;  %1816 = vmatpush3.msra.mxu1 %v2356_v10 }
  0x9f   : > { %1785 = vmatpush3.msra.mxu0 %v398_v24  ;;  %1817 = vmatprep.subr.mxu1 %v2172_v0 }
  0xa0   : > { %1786 = vmatprep.subr.mxu0 %v2172_v0  ;;  %1818 = vmatpush3.msra.mxu1 %v2358_v11 }
  0xa1   : > { %1787 = vmatpush3.msra.mxu0 %v405_v25  ;;  %1819 = vmatprep.subr.mxu1 %v2172_v0 }
  0xa2   : > { %1788 = vmatprep.subr.mxu0 %v2172_v0  ;;  %1820 = vmatpush3.msra.mxu1 %v2360_v12 }
  0xa3   : > { %1789 = vmatpush3.msra.mxu0 %v412_v26  ;;  %1821 = vmatprep.subr.mxu1 %v2172_v0 }
  0xa4   : > { %1790 = vmatprep.subr.mxu0 %v2172_v0  ;;  %1822 = vmatpush3.msra.mxu1 %v2372_v18 }
  0xa5   : > { %1791 = vmatpush3.msra.mxu0 %v419_v27  ;;  %1823 = vmatprep.subr.mxu1 %v2172_v0 }
  0xa6   : > { %1792 = vmatprep.subr.mxu0 %v2172_v0  ;;  %1824 = vmatpush3.msra.mxu1 %v2384_v22 }
  0xa7   : > { %1793 = vmatpush3.msra.mxu0 %v426_v28  ;;  %1825 = vmatprep.subr.mxu1 %v2172_v0 }
  0xa8   : > { %1794 = vmatprep.subr.mxu0 %v2172_v0  ;;  %1826 = vmatpush3.msra.mxu1 %v2427_v48 }
  0xa9   : > { %1795 = vmatpush3.msra.mxu0 %v433_v44  ;;  %1827 = vmatprep.subr.mxu1 %v2172_v0 }
  0xaa   : > { %1796 = vmatprep.subr.mxu0 %v2172_v0  ;;  %1828 = vmatpush3.msra.mxu1 %v2429_v49 }
  0xab   : > { %1797 = vmatpush3.msra.mxu0 %v440_v52  ;;  %1829 = vmatprep.subr.mxu1 %v2172_v0 }
  0xac   : > { %1798 = vmatprep.subr.mxu0 %v2172_v0  ;;  %1830 = vmatpush3.msra.mxu1 %v2431_v50 }
  0xad   : > { %1799 = vmatpush3.msra.mxu0 %v447_v1  ;;  %1831 = vmatprep.subr.mxu1 %v2172_v0 }
  0xae   : > { %1800 = vmatprep.subr.mxu0 %v2172_v0  ;;  %1806 = vmatprep.mubr.msk.f32.mxu0 %vm2173_vm1, %v2172_v0 }
  0xaf   : > { %1801 = vmatpush3.msra.mxu0 %v454_v14  ;;  %1832 = vmatpush3.msra.mxu1 %v2446_v58 }
  0xb0   : > { %1802 = vmatprep.subr.mxu0 %v2172_v0  ;;  %1833 = vmatprep.mubr.msk.f32.mxu1 %vm2173_vm1, %v2172_v0 }
  0xb1   : > { %1803 = vmatpush3.msra.mxu0 %v461_v37  ;;  %1834 = vmatmul.mubr.f32.vlgmr.msra.gmra.mxu1 %v2512_v36 }
  0xb2   : > { %1804 = vmatprep.subr.mxu0 %v2172_v0  ;;  %1847 = vmatprep.subr.mxu1 %v2172_v0 }
  0xb3   : > { %1805 = vmatpush3.msra.mxu0 %v468_v43  ;;  %1855 = vmatprep.mubr.msk.f32.mxu1 %vm2173_vm1, %v2172_v0 }
  0xb4   : > { %1807 = vmatmul.mubr.f32.vlgmr.msra.gmra.mxu0 %v2512_v36  ;;  %1836 = vmatprep.subr.mxu0 %v2172_v0 }
  0xb5   : > { %1844 = vmatprep.mubr.msk.f32.mxu0 %vm2173_vm1, %v2172_v0  ;;  %1837 = vmatpush3.msra.mxu0 %v2653_v51 }
  0xb6   : > { %1838 = vmatprep.subr.mxu0 %v2172_v0  ;;  %1848 = vmatpush3.msra.mxu1 %v1062_v63 }
  0xb7   : > { %1839 = vmatpush3.msra.mxu0 %v2655_v53  ;;  %1849 = vmatprep.subr.mxu1 %v2172_v0 }
  0xb8   : > { %1840 = vmatprep.subr.mxu0 %v2172_v0  ;;  %1850 = vmatpush3.msra.mxu1 %v1069_v3 }
  0xb9   : > { %1851 = vmatprep.subr.mxu1 %v2172_v0  ;;  %1841 = vmatpush3.msra.mxu0 %v985_v38 }
  0xba   : > { %1842 = vmatprep.subr.mxu0 %v2172_v0 }
 0x13c   : > { %v507_v4 = vpop.f32.mrf.mxu1 }
 0x13e   : > { %v1727_v5 = vpop.f32.mrf.mxu1 }
 0x13f   : > { %v988_v5 = vand.u32 4294901760, %v946_v40 }
 0x141   : > { %1843 = vmatpush3.msra.mxu0 %v988_v5 }
 0x142   : > { %1858 = vmatprep.subr.mxu0 %v2172_v0 }
 0x144   : > { %v376_v6 = vpop.f32.mrf.mxu0 }
 0x145   : > { %v508_v17 = vadd.f32 %v507_v4, %v376_v6  ;;  %v2677_v4 = vsub.f32 %v947_v35, %v985_v38 }
 0x146   : > { %v1700_v10 = vpop.f32.mrf.mxu0 }
 0x147   : > { %v1074_v6 = vand.u32 4294901760, %v2677_v4  ;;  %v2681_v10 = vsub.f32 %v946_v40, %v988_v5 }
 0x156   : > { %v688_v11 = vpop.f32.mrf.mxu1 }
 0x158   : > { %v1781_v12 = vpop.f32.mrf.mxu1 }
 0x159   : > { %v1081_v12 = vand.u32 4294901760, %v2681_v10 }
 0x15c   : > { %v603_v15 = vpop.f32.mrf.mxu0 }
 0x15d   : > { %v604_v18 = vadd.f32 %v603_v15, %v508_v17  ;;  %v1082_v17 = vsub.f32 %v2681_v10, %v1081_v12 }
 0x15e   : > { %v1754_v16 = vpop.f32.mrf.mxu0 }
 0x15f   : > { %v689_v20 = vadd.f32 %v688_v11, %v604_v18  ;;  %v1075_v11 = vsub.f32 %v2677_v4, %v1074_v6 }
 0x161   : > { %v1076_v16 = vand.u32 4294901760, %v1075_v11 }
 0x163   : > { %1852 = vmatpush3.msra.mxu1 %v1076_v16 }
 0x164   : > { %1853 = vmatprep.subr.mxu1 %v2172_v0 }
 0x171   : > { %v878_v19 = vpop.f32.mrf.mxu1 }
 0x173   : > { %v1835_v21 = vpop.f32.mrf.mxu1 }
 0x174   : > { %v795_v22 = vpop.f32.mrf.mxu0 }
 0x175   : > { %v796_v23 = vadd.f32 %v795_v22, %v689_v20 }
 0x176   : > { %v1808_v24 = vpop.f32.mrf.mxu0 }
 0x177   : > { %v879_v25 = vadd.f32 %v878_v19, %v796_v23  ;;  %v1083_v19 = vand.u32 4294901760, %v1082_v17 }
 0x179   : > { %v882_v26 = vadd.f32 1e-08, %v879_v25  ;;  %1854 = vmatpush3.msra.mxu1 %v1083_v19 }
 0x17a   : > { %1869 = vmatprep.subr.mxu1 %v2172_v0 }
 0x17b   : > { %884 = vrot.lane.b32.xlu1 %v882_v26, %s2174_s20  ;;  %889 = vrot.lane.b32.xlu0 %v882_v26, %s2175_s22 }
 0x1ed   : > { %v890_v27 = vpop.permute.xlu0 %889  ;;  %v885_v34 = vpop.permute.xlu1 %884 }
 0x1ee   : > { %1991 = vrcp.f32 %v890_v27 }
 0x1ef   : > { %1993 = vrcp.f32 %v885_v34 }
 0x1fb   : > { %v1992_v28 = vpop.eup %1991 }
 0x1fc   : > { %v2639_v29 = vmul.f32 %v1992_v28, %v879_v25  ;;  %v1994_v44 = vpop.eup %1993 }
 0x1fd   : > { %v2643_v48 = vmul.f32 %v1994_v44, %v879_v25 }
 0x1fe   : > { %913 = vrot.lane.b32.xlu0 %v2639_v29, %s2175_s22 }
 0x1ff   : > { %v895_v49 = vsel %vm894_vm3, %v2643_v48, 0.0 }
 0x21d   : > { %896 = vadd.xlane.f32.xlu0 %v895_v49 }
 0x270   : > { %v914_v50 = vpop.permute.xlu0 %913 }
 0x271   : > { %v916_v52 = vsel %vm894_vm3, %v914_v50, 0.0 }
 0x272   : > { %917 = vadd.xlane.f32.xlu1 %v916_v52 }
 0x2a6   : > { %v897_v2 = vpop.xlane.xlu0 %896 }
 0x2a7   : > { %v898_v14 = vmul.f32 0.03125, %v897_v2 }
 0x2a9   : > { %v899_v30 = vsub.f32 %v2643_v48, %v898_v14 }
 0x2ab   : > { %v900_v43 = vmul.f32 %v899_v30, %v899_v30 }
 0x2ad   : > { %v901_v45 = vsel %vm894_vm3, %v900_v43, 0.0 }
 0x2fb   : > { %v918_v56 = vpop.xlane.xlu1 %917 }
 0x2fc   : > { %v919_v57 = vmul.f32 0.03125, %v918_v56 }
 0x2fe   : > { %v920_v58 = vsub.f32 %v2639_v29, %v919_v57 }
 0x300   : > { %v921_v1 = vmul.f32 %v920_v58, %v920_v58 }
 0x302   : > { %923 = vrot.lane.b32.xlu0 %v921_v1, %s2175_s22 }
 0x374   : > { %v924_v37 = vpop.permute.xlu0 %923 }
 0x375   : > { %v926_v42 = vsel %vm894_vm3, %v924_v37, 0.0 }
 0x376   : > { %927 = vadd.xlane.f32.xlu1 %v926_v42 }
 0x37a   : > { %902 = vadd.xlane.f32.xlu1 %v901_v45 }
 0x3ff   : > { %v928_v7 = vpop.xlane.xlu1 %927 }
 0x400   : > { %v929_v8 = vmul.f32 0.032258064, %v928_v7 }
 0x402   : > { %1995 = vrsqrt.f32 %v929_v8  ;;  %vm932_vm4 = vcmp.eq.f32.partialorder %v929_v8, inf  ;;  %v935_v33 = vand.u32 2147483648, %v929_v8  ;;  %vm934_vm5 = vcmp.eq.f32.partialorder %v929_v8, 0.0 }
 0x403   : > { %v903_v9 = vpop.xlane.xlu1 %902 }
 0x404   : > { %v904_v13 = vmul.f32 0.032258064, %v903_v9 }
 0x406   : > { %1997 = vrsqrt.f32 %v904_v13  ;;  %vm907_vm6 = vcmp.eq.f32.partialorder %v904_v13, inf  ;;  %v910_v21 = vand.u32 2147483648, %v904_v13  ;;  %vm909_vm7 = vcmp.eq.f32.partialorder %v904_v13, 0.0 }
 0x40f   : > { %v1996_v31 = vpop.eup %1995 }
 0x410   : > { %v931_v32 = vmul.f32 %v1996_v31, %v929_v8 }
 0x412   : > { %v933_v36 = vsel %vm932_vm4, %v929_v8, %v931_v32 }
 0x413   : > { %v936_v39 = vsel %vm934_vm5, %v935_v33, %v933_v36  ;;  %v1998_v15 = vpop.eup %1997 }
 0x414   : > { %v937_v41 = vadd.f32 1e-08, %v936_v39  ;;  %v906_v18 = vmul.f32 %v1998_v15, %v904_v13 }
 0x416   : > { %1999 = vrcp.f32 %v937_v41  ;;  %v908_v20 = vsel %vm907_vm6, %v904_v13, %v906_v18 }
 0x417   : > { %v911_v23 = vsel %vm909_vm7, %v910_v21, %v908_v20 }
 0x423   : > { %v2000_v22 = vpop.eup %1999 }
 0x424   : > { %v939_v24 = vmul.f32 %v2000_v22, %v911_v23 }
 0x426   : > { %v940_v25 = vmul.f32 %v939_v24, %v2639_v29 }
 0x428   : > { %942 = vrot.lane.b32.xlu1 %v940_v25, %s2175_s22 }
 0x49a   : > { %v943_v26 = vpop.permute.xlu1 %942 }
 0x49b   : > { %v945_v27 = vsub.f32 %v2643_v48, %v943_v26 }
 0x49d   : > { %v952_v28 = vsel %vm950_vm8, %v945_v27, 0 }
 0x49e   : > { %v1023_v34 = vand.u32 4294901760, %v952_v28 }
 0x4a0   : > { %v1024_v44 = vsub.f32 %v952_v28, %v1023_v34  ;;  %1856 = vmatmul.mubr.f32.vlgmr.msra.gmra.mxu1 %v1023_v34 }
 0x4a1   : > { %1870 = vmatpush3.msra.mxu1 %v2653_v51  ;;  %1877 = vmatprep.mubr.msk.f32.mxu1 %vm2173_vm1, %v2172_v0 }
 0x4a2   : > { %1871 = vmatprep.subr.mxu1 %v2172_v0  ;;  %v1025_v49 = vand.u32 4294901760, %v1024_v44 }
 0x4a3   : > { %1872 = vmatpush3.msra.mxu1 %v2655_v53 }
 0x4a4   : > { %1873 = vmatprep.subr.mxu1 %v2172_v0  ;;  %v1026_v29 = vsub.f32 %v1024_v44, %v1025_v49 }
 0x4a5   : > { %1874 = vmatpush3.msra.mxu1 %v985_v38 }
 0x4a6   : > { %1875 = vmatprep.subr.mxu1 %v2172_v0  ;;  %v1027_v48 = vand.u32 4294901760, %v1026_v29 }
 0x4a7   : > { %1876 = vmatpush3.msra.mxu1 %v988_v5 }
 0x4a8   : > { %1878 = vmatmul.mubr.f32.vlgmr.msra.gmra.mxu1 %v1025_v49  ;;  %1891 = vmatprep.subr.mxu1 %v2172_v0 }
 0x4a9   : > { %1845 = vmatmul.mubr.f32.vlgmr.msra.gmra.mxu0 %v1027_v48  ;;  %1892 = vmatpush3.msra.mxu1 %v2653_v51 }
 0x4aa   : > { %1859 = vmatpush3.msra.mxu0 %v2658_v54  ;;  %1893 = vmatprep.subr.mxu1 %v2172_v0 }
 0x4ab   : > { %1860 = vmatprep.subr.mxu0 %v2172_v0  ;;  %1894 = vmatpush3.msra.mxu1 %v2655_v53 }
 0x4ac   : > { %1861 = vmatpush3.msra.mxu0 %v2661_v55  ;;  %1895 = vmatprep.subr.mxu1 %v2172_v0 }
 0x4ad   : > { %1862 = vmatprep.subr.mxu0 %v2172_v0  ;;  %1896 = vmatpush3.msra.mxu1 %v985_v38 }
 0x4ae   : > { %1863 = vmatpush3.msra.mxu0 %v2677_v4  ;;  %1897 = vmatprep.subr.mxu1 %v2172_v0 }
 0x4af   : > { %1864 = vmatprep.subr.mxu0 %v2172_v0  ;;  %1866 = vmatprep.mubr.msk.f32.mxu0 %vm2173_vm1, %v2172_v0 }
 0x4b0   : > { %1865 = vmatpush3.msra.mxu0 %v2681_v10  ;;  %1898 = vmatpush3.msra.mxu1 %v988_v5 }
 0x4b1   : > { %1899 = vmatprep.mubr.msk.f32.mxu1 %vm2173_vm1, %v2172_v0  ;;  %1867 = vmatmul.mubr.f32.vlgmr.msra.gmra.mxu0 %v1024_v44 }
 0x4b2   : > { %1880 = vmatprep.subr.mxu0 %v2172_v0  ;;  %1900 = vmatmul.mubr.f32.vlgmr.msra.gmra.mxu1 %v1023_v34 }
 0x4b3   : > { %1881 = vmatpush3.msra.mxu0 %v1060_v59  ;;  %1888 = vmatprep.mubr.msk.f32.mxu0 %vm2173_vm1, %v2172_v0 }
 0x4b4   : > { %1882 = vmatprep.subr.mxu0 %v2172_v0 }
 0x4b5   : > { %1883 = vmatpush3.msra.mxu0 %v1067_v60 }
 0x4b6   : > { %1884 = vmatprep.subr.mxu0 %v2172_v0 }
 0x4b7   : > { %1885 = vmatpush3.msra.mxu0 %v1074_v6 }
 0x4b8   : > { %1886 = vmatprep.subr.mxu0 %v2172_v0 }
 0x4b9   : > { %1887 = vmatpush3.msra.mxu0 %v1081_v12 }
 0x4ba   : > { %1889 = vmatmul.mubr.f32.vlgmr.msra.gmra.mxu0 %v1023_v34 }
 0x560   : > { %v1120_v50 = vpop.f32.mrf.mxu1 }
 0x562   : > { %v1857_v52 = vpop.f32.mrf.mxu1 }
 0x568   : > { %v1277_v56 = vpop.f32.mrf.mxu1 }
 0x569   : > { %v1029_v57 = vpop.f32.mrf.mxu0 }
 0x56a   : > { %v1879_v58 = vpop.f32.mrf.mxu1  ;;  %v1121_v30 = vadd.f32 %v1120_v50, %v1029_v57 }
 0x56b   : > { %v1846_v1 = vpop.f32.mrf.mxu0 }
 0x571   : > { %v1200_v2 = vpop.f32.mrf.mxu0 }
 0x572   : > { %v1435_v14 = vpop.f32.mrf.mxu1  ;;  %v1201_v0 = vadd.f32 %v1200_v2, %v1121_v30 }
 0x573   : > { %v1868_v37 = vpop.f32.mrf.mxu0 }
 0x574   : > { %v1901_v42 = vpop.f32.mrf.mxu1  ;;  %v1278_v43 = vadd.f32 %v1277_v56, %v1201_v0 }
 0x57a   : > { %v1360_v45 = vpop.f32.mrf.mxu0 }
 0x57b   : > { %v1361_v46 = vadd.f32 %v1360_v45, %v1278_v43 }
 0x57c   : > { %v1890_v47 = vpop.f32.mrf.mxu0 }
 0x57d   : > { %v1436_v51 = vadd.f32 %v1435_v14, %v1361_v46 }
 0x57f   : > { %1439 = vst [vmem:[%s232_s5] sm:$0x1] %v1436_v51 }
 0x580   : > { %2094 = shalt.err (!%p2091_p2)
}
 0x581   : > { %s2095_s27 = scalar_lea.hbm %s1451_s21, 16  ;;  %s2099_s30 = scalar_lea.hbm %s2778_s3, 32 }
 0x582   : > { %p2096_p9 = scmp.ne.s32.totalorder %s1451_s21, %s2095_s27  ;;  %p2100_p0 = scmp.lt.s32.totalorder %s1451_s21, %s2778_s3 }
 0x583   : > { %p2101_p7 = scmp.lt.s32.totalorder %s2099_s30, %s2095_s27 }
 0x584   : > { %p2097_p12 = pnand %p2096_p9, %p2298_p3 }
 0x585   : > { %p2102_p5 = por %p2101_p7, %p2100_p0 }
 0x586   : > { %p2098_p13 = pneg %p2097_p12 }
 0x588   : > { %p2103_p1 = pnand %p2102_p5, %p2098_p13 }
 0x58a   : > { %2106 = shalt.err (!%p2103_p1)
}
 0x58b   : > { %1912 = dma.vmem_to_hbm [thread:$0]  (%p2298_p3), %s1454_s7, 16, %s1451_s21, %s1441_s10  }
 0x58c PF: > { %s1465_s22 = sand.u32 1, %s2145_s12   ;;  %p2789_p4 = scmp.ne.s32.totalorder %s2783_s23, 0 }
 0x58d   : > { %p2790_p6 = scmp.ge.s32.totalorder %s2165_s17, 2  ;;  %s1466_s24 = scalar_lea.sflag [#allocation5], %s1465_s22 }
 0x58f   : > { %p1926_p8 = pnand %p2790_p6, %p2789_p4 }
 0x591   : > { %p1927_p10 = pneg %p1926_p8 }
 0x593   : > { %2140 = dma.done.wait (%p1927_p10), %s1466_s24, 16  }
 0x594   : > { %2142 = vsyncadd (%p1927_p10), %s1466_s24, 4294967280  ;;  %s20_s17 = sadd.s32 1, %s2165_s17   ;;  %s2791_s12 = smov %s2149_s13 }
 0x595   : > { %p17_p11 = scmp.ge.s32.totalorder %s20_s17, 4   ;;  %s2792_s13 = smov %s2153_s14 }
 0x596   : > { %s2793_s14 = smov %s2307_s29  ;;  %s2794_s15 = smov %s2161_s16 }
 0x597   : > { %s2795_s16 = smov %s2797_s11  ;;  %19 = sbr.rel (!%p17_p11) target bundleno = 7 (0x7), region = 93 }
 0x59c   :  { %1470 = vsyncpa [#allocation4], 1 }
 0x59d   :  { %1472 = vsyncpa [#allocation4 + $0x1], 1 }
 0x59e   :  { %1473 = vsyncpa [#allocation7], 1 }
 0x59f   :  { %1474 = vsyncpa [#allocation5], 1 }
 0x5a0   :  { %1476 = vsyncpa [#allocation5 + $0x1], 1 }

</bundles_post_ra>
